<compile_context>
chip_gen: v7x
topology: tpu7x:2x2x1
jax: 0.10.0
libtpu: 0.0.40
codegen_flags: <defaults>
</compile_context>

<pallas_src>
import functools

import jax
import jax.numpy as jnp
from jax.experimental import pallas as pl
from jax.experimental.pallas import tpu as pltpu


def _shift2d4xn_kernel(x_ref, o_ref, *, stride, nb_shifts, W, L_seg):
    # x_ref: (C_BLK, L)  ;  o_ref: (num, C_BLK, L) with L = k_pack * H * W on lanes.
    c_blk, L = x_ref.shape
    z = jnp.array(0, dtype=x_ref.dtype)

    # Single-row lane iota; masks broadcast along sublanes inside jnp.where.
    lane = jax.lax.broadcasted_iota(jnp.int32, (1, L), 1)
    pos = lane if L_seg == L else lane % L_seg   # position inside one channel segment
    col = lane % W                               # w position inside each spatial row

    # identity slab (first chunk of the channel concat)
    o_ref[0] = x_ref[...]

    for n in range(nb_shifts):                   # small static unroll (12 slabs)
        m = (n + 1) * stride
        mW = m * W
        k = 1 + 4 * n
        # Re-read x from VMEM per slab: bounded vreg live ranges at large c_blk;
        # VMEM loads are hidden under the HBM writeback that bounds this kernel.
        # up:    out[h, w] = x[h+m, w]   (zeros for h >= H-m)
        o_ref[k + 0] = jnp.where(pos < L_seg - mW, jnp.roll(x_ref[...], -mW, axis=1), z)
        # down:  out[h, w] = x[h-m, w]   (zeros for h < m)
        o_ref[k + 1] = jnp.where(pos >= mW, jnp.roll(x_ref[...], mW, axis=1), z)
        # left:  out[h, w] = x[h, w+m]   (zeros for w >= W-m)
        o_ref[k + 2] = jnp.where(col < W - m, jnp.roll(x_ref[...], -m, axis=1), z)
        # right: out[h, w] = x[h, w-m]   (zeros for w < m)
        o_ref[k + 3] = jnp.where(col >= m, jnp.roll(x_ref[...], m, axis=1), z)


def _vmem_capacity_bytes():
    """Per-core VMEM capacity; conservative (v7x-sized) fallback if unavailable."""
    try:
        return int(pltpu.get_tpu_info().vmem_capacity_bytes)
    except Exception:
        return 64 << 20


def _pick_c_block(N, C, L, itemsize, num, budget_bytes, min_steps=8):
    """Pick the channel block size.

    Candidates are divisors of C that are either a multiple of the dtype's
    packed-sublane tile (32 // itemsize: 8 f32 / 16 bf16 / 32 int8) or equal C
    (the (8,128) tiling rule).  Preference order:
      1) largest candidate whose (input + 13x output) block fits `budget_bytes`
         AND still yields >= min_steps grid steps (pipeline depth / megacore),
      2) else largest in-budget candidate,
      3) else the smallest valid candidate (minimizes VMEM; never silently
         ignores the budget like the previous `return C` fallback did).
    """
    sub = max(8, 32 // max(1, itemsize))
    per_channel = (num + 1) * L * itemsize
    cands = [d for d in range(1, C + 1) if C % d == 0 and (d % sub == 0 or d == C)]
    in_budget = [d for d in cands if d * per_channel <= budget_bytes]
    pool = in_budget if in_budget else [min(cands)]
    enough = [d for d in pool if N * (C // d) >= min_steps]
    return max(enough) if enough else max(pool)


def shift2d4xn(x, stride=3, nb_shifts=3):
    """x: (N, C, H, W) -> (N, C*(1+4*nb_shifts), H, W) — matches torch.cat order."""
    N, C, H, W = x.shape
    num = 1 + 4 * nb_shifts
    assert nb_shifts * stride < min(H, W), "shift exceeds spatial extent"

    L = H * W
    itemsize = jnp.dtype(x.dtype).itemsize

    # Lane-density packing for small spatial stages (e.g. 8x8 -> L=64): fold
    # k = 128 // L channels into one lane row so stores are full 128-lane vst
    # and writeback DMA rows are >= 512 B.  Contiguous reshape, free.
    k_pack = 1
    if L < 128 and 128 % L == 0 and C % (128 // L) == 0:
        k_pack = 128 // L
    Cp = C // k_pack
    Lp = L * k_pack

    x_flat = x.reshape(N, Cp, Lp)        # contiguous view, free

    # Generation-aware per-step block budget: double-buffered (in + 13x out)
    # must stay well inside this chip's VMEM with headroom for compiler scratch.
    cap_bytes = _vmem_capacity_bytes()
    budget = max(4 << 20, min(48 << 20, (int(0.65 * cap_bytes) - (4 << 20)) // 2))
    c_blk = _pick_c_block(N, Cp, Lp, itemsize, num, budget)
    grid = (N, Cp // c_blk)

    kern = functools.partial(_shift2d4xn_kernel,
                             stride=stride, nb_shifts=nb_shifts, W=W, L_seg=L)

    # VMEM budget: both blocks are double-buffered by the pipeline.
    block_bytes = (num + 1) * c_blk * Lp * itemsize
    vmem_need = 2 * block_bytes + (2 << 20)
    cp_kwargs = dict(dimension_semantics=("parallel", "parallel"))
    if vmem_need > (16 << 20):           # only raise above the smallest default (v5e)
        cp_kwargs["vmem_limit_bytes"] = int(
            min(max(vmem_need, 32 << 20), int(0.85 * cap_bytes)))

    out = pl.pallas_call(
        kern,
        out_shape=jax.ShapeDtypeStruct((N, num, Cp, Lp), x.dtype),
        grid=grid,
        in_specs=[pl.BlockSpec((pl.Squeezed(), c_blk, Lp),
                               lambda n, cb: (n, cb, 0))],
        out_specs=pl.BlockSpec((pl.Squeezed(), num, c_blk, Lp),
                               lambda n, cb: (n, 0, cb, 0)),
        compiler_params=pltpu.CompilerParams(**cp_kwargs),
        cost_estimate=pl.CostEstimate(
            flops=0, transcendentals=0,
            bytes_accessed=(1 + num) * N * C * L * itemsize),
    )(x_flat)

    # (N, num, Cp, Lp) == (N, num, C, L) in memory -> (N, num*C, H, W):
    # contiguous reshape; channel order is slab-major, i.e. exactly
    # torch.cat([x, up1, down1, left1, right1, up2, ...], dim=1).
    return out.reshape(N, num * C, H, W)


def shift2d4xn_ref(x, stride=3, nb_shifts=3):
    """Pure-JAX reference mirroring the PyTorch forward."""
    N, C, H, W = x.shape
    outs = [x]
    for n in range(nb_shifts):
        m = (n + 1) * stride
        outs.append(jnp.pad(x, ((0, 0), (0, 0), (0, m), (0, 0)))[:, :, m:, :])
        outs.append(jnp.pad(x, ((0, 0), (0, 0), (m, 0), (0, 0)))[:, :, :H, :])
        outs.append(jnp.pad(x, ((0, 0), (0, 0), (0, 0), (0, m)))[:, :, :, m:])
        outs.append(jnp.pad(x, ((0, 0), (0, 0), (0, 0), (m, 0)))[:, :, :, :W])
    return jnp.concatenate(outs, axis=1)


if __name__ == "__main__":
    # 16x16 stage (L = 256, multiple of 128 -> no lane packing).
    x1 = jax.random.normal(jax.random.PRNGKey(0), (2, 4, 16, 16), dtype=jnp.float32)
    out1 = jax.block_until_ready(shift2d4xn(x1, stride=3, nb_shifts=3))
    ref1 = shift2d4xn_ref(x1, stride=3, nb_shifts=3)
    assert out1.shape == (2, 4 * 13, 16, 16), out1.shape
    assert jnp.allclose(out1, ref1), "mismatch vs reference (16x16)"

    # 8x8 stage (L = 64 < 128 -> lane-packing path: 2 channels per lane row).
    x2 = jax.random.normal(jax.random.PRNGKey(1), (2, 8, 8, 8), dtype=jnp.float32)
    out2 = jax.block_until_ready(shift2d4xn(x2, stride=2, nb_shifts=3))
    ref2 = shift2d4xn_ref(x2, stride=2, nb_shifts=3)
    assert out2.shape == (2, 8 * 13, 8, 8), out2.shape
    assert jnp.allclose(out2, ref2), "mismatch vs reference (8x8 packed)"

    print("KERNEL_OK")
</pallas_src>

<mosaic_0001>
module attributes {stable_mosaic.version = 11 : i64} {
  func.func @_shift2d4xn_kernel(%arg0: i32, %arg1: i32, %arg2: memref<1x4x256xf32, #tpu.memory_space<vmem>>, %arg3: memref<1x13x4x256xf32, #tpu.memory_space<vmem>>) attributes {dimension_semantics = [#tpu.dimension_semantics<parallel>, #tpu.dimension_semantics<parallel>], iteration_bounds = array<i64: 2, 1>, scalar_prefetch = 0 : i64, scratch_operands = 0 : i64, tpu.core_type = #tpu.core_type<tc>, window_params = [{transform_indices = @transform_0, window_bounds = array<i64: 1, 4, 256>}, {transform_indices = @transform_1, window_bounds = array<i64: 1, 13, 4, 256>}]} {
    %0 = tpu.iota {dimensions = array<i32: 1>} : vector<1x256xi32>
    %c16_i32 = arith.constant 16 : i32
    %c0_i32 = arith.constant 0 : i32
    %1 = arith.cmpi eq, %c16_i32, %c0_i32 : i32
    %c1_i32 = arith.constant 1 : i32
    %2 = arith.select %1, %c1_i32, %c16_i32 : i32
    %3 = vector.broadcast %2 : i32 to vector<1x256xi32>
    %4 = arith.remsi %0, %3 : vector<1x256xi32>
    %c0_i32_0 = arith.constant 0 : i32
    %5 = vector.broadcast %c0_i32_0 : i32 to vector<1x256xi32>
    %6 = arith.cmpi ne, %4, %5 : vector<1x256xi32>
    %c0_i32_1 = arith.constant 0 : i32
    %7 = vector.broadcast %c0_i32_1 : i32 to vector<1x256xi32>
    %8 = arith.cmpi slt, %4, %7 : vector<1x256xi32>
    %c0_i32_2 = arith.constant 0 : i32
    %9 = arith.cmpi slt, %2, %c0_i32_2 : i32
    %10 = vector.broadcast %9 : i1 to vector<1x256xi1>
    %11 = vector.broadcast %10 : vector<1x256xi1> to vector<1x256xi1>
    %12 = arith.xori %8, %11 : vector<1x256xi1>
    %13 = arith.andi %12, %6 : vector<1x256xi1>
    %14 = vector.broadcast %2 : i32 to vector<1x256xi32>
    %15 = arith.addi %4, %14 : vector<1x256xi32>
    %16 = arith.select %13, %15, %4 : vector<1x256xi1>, vector<1x256xi32>
    %c0 = arith.constant 0 : index
    %c0_3 = arith.constant 0 : index
    %c0_4 = arith.constant 0 : index
    %17 = vector.load %arg2[%c0, %c0_3, %c0_4] : memref<1x4x256xf32, #tpu.memory_space<vmem>>, vector<1x4x256xf32>
    %18 = vector.shape_cast %17 : vector<1x4x256xf32> to vector<4x256xf32>
    %c0_5 = arith.constant 0 : index
    %c0_6 = arith.constant 0 : index
    %c0_7 = arith.constant 0 : index
    %c0_8 = arith.constant 0 : index
    %19 = vector.load %arg3[%c0_5, %c0_6, %c0_7, %c0_8] : memref<1x13x4x256xf32, #tpu.memory_space<vmem>>, vector<1x1x4x256xf32>
    %20 = vector.shape_cast %19 : vector<1x1x4x256xf32> to vector<4x256xf32>
    %21 = vector.shape_cast %18 : vector<4x256xf32> to vector<1x1x4x256xf32>
    tpu.vector_store %arg3[%c0_5, %c0_6, %c0_7, %c0_8], %21 {strides = array<i32>} : memref<1x13x4x256xf32, #tpu.memory_space<vmem>>, vector<1x1x4x256xf32>,
    %c208_i32 = arith.constant 208 : i32
    %22 = vector.broadcast %c208_i32 : i32 to vector<1x256xi32>
    %23 = arith.cmpi slt, %0, %22 : vector<1x256xi32>
    %c0_9 = arith.constant 0 : index
    %c0_10 = arith.constant 0 : index
    %c0_11 = arith.constant 0 : index
    %24 = vector.load %arg2[%c0_9, %c0_10, %c0_11] : memref<1x4x256xf32, #tpu.memory_space<vmem>>, vector<1x4x256xf32>
    %25 = vector.shape_cast %24 : vector<1x4x256xf32> to vector<4x256xf32>
    %26 = vector.extract_strided_slice %25 {offsets = [0, 48], sizes = [4, 208], strides = [1, 1]} : vector<4x256xf32> to vector<4x208xf32>
    %27 = vector.extract_strided_slice %25 {offsets = [0, 0], sizes = [4, 48], strides = [1, 1]} : vector<4x256xf32> to vector<4x48xf32>
    %28 = tpu.concatenate %26, %27 in 1 : vector<4x208xf32>, vector<4x48xf32> -> vector<4x256xf32>
    %cst = arith.constant 0.000000e+00 : f32
    %29 = vector.shape_cast %23 : vector<1x256xi1> to vector<1x256xi1>
    %30 = vector.broadcast %29 : vector<1x256xi1> to vector<4x256xi1>
    %31 = vector.broadcast %cst : f32 to vector<4x256xf32>
    %32 = arith.select %30, %28, %31 : vector<4x256xi1>, vector<4x256xf32>
    %c0_12 = arith.constant 0 : index
    %c1 = arith.constant 1 : index
    %c0_13 = arith.constant 0 : index
    %c0_14 = arith.constant 0 : index
    %33 = vector.load %arg3[%c0_12, %c1, %c0_13, %c0_14] : memref<1x13x4x256xf32, #tpu.memory_space<vmem>>, vector<1x1x4x256xf32>
    %34 = vector.shape_cast %33 : vector<1x1x4x256xf32> to vector<4x256xf32>
    %35 = vector.shape_cast %32 : vector<4x256xf32> to vector<1x1x4x256xf32>
    tpu.vector_store %arg3[%c0_12, %c1, %c0_13, %c0_14], %35 {strides = array<i32>} : memref<1x13x4x256xf32, #tpu.memory_space<vmem>>, vector<1x1x4x256xf32>,
    %c48_i32 = arith.constant 48 : i32
    %36 = vector.broadcast %c48_i32 : i32 to vector<1x256xi32>
    %37 = arith.cmpi sge, %0, %36 : vector<1x256xi32>
    %c0_15 = arith.constant 0 : index
    %c0_16 = arith.constant 0 : index
    %c0_17 = arith.constant 0 : index
    %38 = vector.load %arg2[%c0_15, %c0_16, %c0_17] : memref<1x4x256xf32, #tpu.memory_space<vmem>>, vector<1x4x256xf32>
    %39 = vector.shape_cast %38 : vector<1x4x256xf32> to vector<4x256xf32>
    %40 = vector.extract_strided_slice %39 {offsets = [0, 208], sizes = [4, 48], strides = [1, 1]} : vector<4x256xf32> to vector<4x48xf32>
    %41 = vector.extract_strided_slice %39 {offsets = [0, 0], sizes = [4, 208], strides = [1, 1]} : vector<4x256xf32> to vector<4x208xf32>
    %42 = tpu.concatenate %40, %41 in 1 : vector<4x48xf32>, vector<4x208xf32> -> vector<4x256xf32>
    %cst_18 = arith.constant 0.000000e+00 : f32
    %43 = vector.shape_cast %37 : vector<1x256xi1> to vector<1x256xi1>
    %44 = vector.broadcast %43 : vector<1x256xi1> to vector<4x256xi1>
    %45 = vector.broadcast %cst_18 : f32 to vector<4x256xf32>
    %46 = arith.select %44, %42, %45 : vector<4x256xi1>, vector<4x256xf32>
    %c0_19 = arith.constant 0 : index
    %c2 = arith.constant 2 : index
    %c0_20 = arith.constant 0 : index
    %c0_21 = arith.constant 0 : index
    %47 = vector.load %arg3[%c0_19, %c2, %c0_20, %c0_21] : memref<1x13x4x256xf32, #tpu.memory_space<vmem>>, vector<1x1x4x256xf32>
    %48 = vector.shape_cast %47 : vector<1x1x4x256xf32> to vector<4x256xf32>
    %49 = vector.shape_cast %46 : vector<4x256xf32> to vector<1x1x4x256xf32>
    tpu.vector_store %arg3[%c0_19, %c2, %c0_20, %c0_21], %49 {strides = array<i32>} : memref<1x13x4x256xf32, #tpu.memory_space<vmem>>, vector<1x1x4x256xf32>,
    %c13_i32 = arith.constant 13 : i32
    %50 = vector.broadcast %c13_i32 : i32 to vector<1x256xi32>
    %51 = arith.cmpi slt, %16, %50 : vector<1x256xi32>
    %c0_22 = arith.constant 0 : index
    %c0_23 = arith.constant 0 : index
    %c0_24 = arith.constant 0 : index
    %52 = vector.load %arg2[%c0_22, %c0_23, %c0_24] : memref<1x4x256xf32, #tpu.memory_space<vmem>>, vector<1x4x256xf32>
    %53 = vector.shape_cast %52 : vector<1x4x256xf32> to vector<4x256xf32>
    %54 = vector.extract_strided_slice %53 {offsets = [0, 3], sizes = [4, 253], strides = [1, 1]} : vector<4x256xf32> to vector<4x253xf32>
    %55 = vector.extract_strided_slice %53 {offsets = [0, 0], sizes = [4, 3], strides = [1, 1]} : vector<4x256xf32> to vector<4x3xf32>
    %56 = tpu.concatenate %54, %55 in 1 : vector<4x253xf32>, vector<4x3xf32> -> vector<4x256xf32>
    %cst_25 = arith.constant 0.000000e+00 : f32
    %57 = vector.shape_cast %51 : vector<1x256xi1> to vector<1x256xi1>
    %58 = vector.broadcast %57 : vector<1x256xi1> to vector<4x256xi1>
    %59 = vector.broadcast %cst_25 : f32 to vector<4x256xf32>
    %60 = arith.select %58, %56, %59 : vector<4x256xi1>, vector<4x256xf32>
    %c0_26 = arith.constant 0 : index
    %c3 = arith.constant 3 : index
    %c0_27 = arith.constant 0 : index
    %c0_28 = arith.constant 0 : index
    %61 = vector.load %arg3[%c0_26, %c3, %c0_27, %c0_28] : memref<1x13x4x256xf32, #tpu.memory_space<vmem>>, vector<1x1x4x256xf32>
    %62 = vector.shape_cast %61 : vector<1x1x4x256xf32> to vector<4x256xf32>
    %63 = vector.shape_cast %60 : vector<4x256xf32> to vector<1x1x4x256xf32>
    tpu.vector_store %arg3[%c0_26, %c3, %c0_27, %c0_28], %63 {strides = array<i32>} : memref<1x13x4x256xf32, #tpu.memory_space<vmem>>, vector<1x1x4x256xf32>,
    %c3_i32 = arith.constant 3 : i32
    %64 = vector.broadcast %c3_i32 : i32 to vector<1x256xi32>
    %65 = arith.cmpi sge, %16, %64 : vector<1x256xi32>
    %c0_29 = arith.constant 0 : index
    %c0_30 = arith.constant 0 : index
    %c0_31 = arith.constant 0 : index
    %66 = vector.load %arg2[%c0_29, %c0_30, %c0_31] : memref<1x4x256xf32, #tpu.memory_space<vmem>>, vector<1x4x256xf32>
    %67 = vector.shape_cast %66 : vector<1x4x256xf32> to vector<4x256xf32>
    %68 = vector.extract_strided_slice %67 {offsets = [0, 253], sizes = [4, 3], strides = [1, 1]} : vector<4x256xf32> to vector<4x3xf32>
    %69 = vector.extract_strided_slice %67 {offsets = [0, 0], sizes = [4, 253], strides = [1, 1]} : vector<4x256xf32> to vector<4x253xf32>
    %70 = tpu.concatenate %68, %69 in 1 : vector<4x3xf32>, vector<4x253xf32> -> vector<4x256xf32>
    %cst_32 = arith.constant 0.000000e+00 : f32
    %71 = vector.shape_cast %65 : vector<1x256xi1> to vector<1x256xi1>
    %72 = vector.broadcast %71 : vector<1x256xi1> to vector<4x256xi1>
    %73 = vector.broadcast %cst_32 : f32 to vector<4x256xf32>
    %74 = arith.select %72, %70, %73 : vector<4x256xi1>, vector<4x256xf32>
    %c0_33 = arith.constant 0 : index
    %c4 = arith.constant 4 : index
    %c0_34 = arith.constant 0 : index
    %c0_35 = arith.constant 0 : index
    %75 = vector.load %arg3[%c0_33, %c4, %c0_34, %c0_35] : memref<1x13x4x256xf32, #tpu.memory_space<vmem>>, vector<1x1x4x256xf32>
    %76 = vector.shape_cast %75 : vector<1x1x4x256xf32> to vector<4x256xf32>
    %77 = vector.shape_cast %74 : vector<4x256xf32> to vector<1x1x4x256xf32>
    tpu.vector_store %arg3[%c0_33, %c4, %c0_34, %c0_35], %77 {strides = array<i32>} : memref<1x13x4x256xf32, #tpu.memory_space<vmem>>, vector<1x1x4x256xf32>,
    %c160_i32 = arith.constant 160 : i32
    %78 = vector.broadcast %c160_i32 : i32 to vector<1x256xi32>
    %79 = arith.cmpi slt, %0, %78 : vector<1x256xi32>
    %c0_36 = arith.constant 0 : index
    %c0_37 = arith.constant 0 : index
    %c0_38 = arith.constant 0 : index
    %80 = vector.load %arg2[%c0_36, %c0_37, %c0_38] : memref<1x4x256xf32, #tpu.memory_space<vmem>>, vector<1x4x256xf32>
    %81 = vector.shape_cast %80 : vector<1x4x256xf32> to vector<4x256xf32>
    %82 = vector.extract_strided_slice %81 {offsets = [0, 96], sizes = [4, 160], strides = [1, 1]} : vector<4x256xf32> to vector<4x160xf32>
    %83 = vector.extract_strided_slice %81 {offsets = [0, 0], sizes = [4, 96], strides = [1, 1]} : vector<4x256xf32> to vector<4x96xf32>
    %84 = tpu.concatenate %82, %83 in 1 : vector<4x160xf32>, vector<4x96xf32> -> vector<4x256xf32>
    %cst_39 = arith.constant 0.000000e+00 : f32
    %85 = vector.shape_cast %79 : vector<1x256xi1> to vector<1x256xi1>
    %86 = vector.broadcast %85 : vector<1x256xi1> to vector<4x256xi1>
    %87 = vector.broadcast %cst_39 : f32 to vector<4x256xf32>
    %88 = arith.select %86, %84, %87 : vector<4x256xi1>, vector<4x256xf32>
    %c0_40 = arith.constant 0 : index
    %c5 = arith.constant 5 : index
    %c0_41 = arith.constant 0 : index
    %c0_42 = arith.constant 0 : index
    %89 = vector.load %arg3[%c0_40, %c5, %c0_41, %c0_42] : memref<1x13x4x256xf32, #tpu.memory_space<vmem>>, vector<1x1x4x256xf32>
    %90 = vector.shape_cast %89 : vector<1x1x4x256xf32> to vector<4x256xf32>
    %91 = vector.shape_cast %88 : vector<4x256xf32> to vector<1x1x4x256xf32>
    tpu.vector_store %arg3[%c0_40, %c5, %c0_41, %c0_42], %91 {strides = array<i32>} : memref<1x13x4x256xf32, #tpu.memory_space<vmem>>, vector<1x1x4x256xf32>,
    %c96_i32 = arith.constant 96 : i32
    %92 = vector.broadcast %c96_i32 : i32 to vector<1x256xi32>
    %93 = arith.cmpi sge, %0, %92 : vector<1x256xi32>
    %c0_43 = arith.constant 0 : index
    %c0_44 = arith.constant 0 : index
    %c0_45 = arith.constant 0 : index
    %94 = vector.load %arg2[%c0_43, %c0_44, %c0_45] : memref<1x4x256xf32, #tpu.memory_space<vmem>>, vector<1x4x256xf32>
    %95 = vector.shape_cast %94 : vector<1x4x256xf32> to vector<4x256xf32>
    %96 = vector.extract_strided_slice %95 {offsets = [0, 160], sizes = [4, 96], strides = [1, 1]} : vector<4x256xf32> to vector<4x96xf32>
    %97 = vector.extract_strided_slice %95 {offsets = [0, 0], sizes = [4, 160], strides = [1, 1]} : vector<4x256xf32> to vector<4x160xf32>
    %98 = tpu.concatenate %96, %97 in 1 : vector<4x96xf32>, vector<4x160xf32> -> vector<4x256xf32>
    %cst_46 = arith.constant 0.000000e+00 : f32
    %99 = vector.shape_cast %93 : vector<1x256xi1> to vector<1x256xi1>
    %100 = vector.broadcast %99 : vector<1x256xi1> to vector<4x256xi1>
    %101 = vector.broadcast %cst_46 : f32 to vector<4x256xf32>
    %102 = arith.select %100, %98, %101 : vector<4x256xi1>, vector<4x256xf32>
    %c0_47 = arith.constant 0 : index
    %c6 = arith.constant 6 : index
    %c0_48 = arith.constant 0 : index
    %c0_49 = arith.constant 0 : index
    %103 = vector.load %arg3[%c0_47, %c6, %c0_48, %c0_49] : memref<1x13x4x256xf32, #tpu.memory_space<vmem>>, vector<1x1x4x256xf32>
    %104 = vector.shape_cast %103 : vector<1x1x4x256xf32> to vector<4x256xf32>
    %105 = vector.shape_cast %102 : vector<4x256xf32> to vector<1x1x4x256xf32>
    tpu.vector_store %arg3[%c0_47, %c6, %c0_48, %c0_49], %105 {strides = array<i32>} : memref<1x13x4x256xf32, #tpu.memory_space<vmem>>, vector<1x1x4x256xf32>,
    %c10_i32 = arith.constant 10 : i32
    %106 = vector.broadcast %c10_i32 : i32 to vector<1x256xi32>
    %107 = arith.cmpi slt, %16, %106 : vector<1x256xi32>
    %c0_50 = arith.constant 0 : index
    %c0_51 = arith.constant 0 : index
    %c0_52 = arith.constant 0 : index
    %108 = vector.load %arg2[%c0_50, %c0_51, %c0_52] : memref<1x4x256xf32, #tpu.memory_space<vmem>>, vector<1x4x256xf32>
    %109 = vector.shape_cast %108 : vector<1x4x256xf32> to vector<4x256xf32>
    %110 = vector.extract_strided_slice %109 {offsets = [0, 6], sizes = [4, 250], strides = [1, 1]} : vector<4x256xf32> to vector<4x250xf32>
    %111 = vector.extract_strided_slice %109 {offsets = [0, 0], sizes = [4, 6], strides = [1, 1]} : vector<4x256xf32> to vector<4x6xf32>
    %112 = tpu.concatenate %110, %111 in 1 : vector<4x250xf32>, vector<4x6xf32> -> vector<4x256xf32>
    %cst_53 = arith.constant 0.000000e+00 : f32
    %113 = vector.shape_cast %107 : vector<1x256xi1> to vector<1x256xi1>
    %114 = vector.broadcast %113 : vector<1x256xi1> to vector<4x256xi1>
    %115 = vector.broadcast %cst_53 : f32 to vector<4x256xf32>
    %116 = arith.select %114, %112, %115 : vector<4x256xi1>, vector<4x256xf32>
    %c0_54 = arith.constant 0 : index
    %c7 = arith.constant 7 : index
    %c0_55 = arith.constant 0 : index
    %c0_56 = arith.constant 0 : index
    %117 = vector.load %arg3[%c0_54, %c7, %c0_55, %c0_56] : memref<1x13x4x256xf32, #tpu.memory_space<vmem>>, vector<1x1x4x256xf32>
    %118 = vector.shape_cast %117 : vector<1x1x4x256xf32> to vector<4x256xf32>
    %119 = vector.shape_cast %116 : vector<4x256xf32> to vector<1x1x4x256xf32>
    tpu.vector_store %arg3[%c0_54, %c7, %c0_55, %c0_56], %119 {strides = array<i32>} : memref<1x13x4x256xf32, #tpu.memory_space<vmem>>, vector<1x1x4x256xf32>,
    %c6_i32 = arith.constant 6 : i32
    %120 = vector.broadcast %c6_i32 : i32 to vector<1x256xi32>
    %121 = arith.cmpi sge, %16, %120 : vector<1x256xi32>
    %c0_57 = arith.constant 0 : index
    %c0_58 = arith.constant 0 : index
    %c0_59 = arith.constant 0 : index
    %122 = vector.load %arg2[%c0_57, %c0_58, %c0_59] : memref<1x4x256xf32, #tpu.memory_space<vmem>>, vector<1x4x256xf32>
    %123 = vector.shape_cast %122 : vector<1x4x256xf32> to vector<4x256xf32>
    %124 = vector.extract_strided_slice %123 {offsets = [0, 250], sizes = [4, 6], strides = [1, 1]} : vector<4x256xf32> to vector<4x6xf32>
    %125 = vector.extract_strided_slice %123 {offsets = [0, 0], sizes = [4, 250], strides = [1, 1]} : vector<4x256xf32> to vector<4x250xf32>
    %126 = tpu.concatenate %124, %125 in 1 : vector<4x6xf32>, vector<4x250xf32> -> vector<4x256xf32>
    %cst_60 = arith.constant 0.000000e+00 : f32
    %127 = vector.shape_cast %121 : vector<1x256xi1> to vector<1x256xi1>
    %128 = vector.broadcast %127 : vector<1x256xi1> to vector<4x256xi1>
    %129 = vector.broadcast %cst_60 : f32 to vector<4x256xf32>
    %130 = arith.select %128, %126, %129 : vector<4x256xi1>, vector<4x256xf32>
    %c0_61 = arith.constant 0 : index
    %c8 = arith.constant 8 : index
    %c0_62 = arith.constant 0 : index
    %c0_63 = arith.constant 0 : index
    %131 = vector.load %arg3[%c0_61, %c8, %c0_62, %c0_63] : memref<1x13x4x256xf32, #tpu.memory_space<vmem>>, vector<1x1x4x256xf32>
    %132 = vector.shape_cast %131 : vector<1x1x4x256xf32> to vector<4x256xf32>
    %133 = vector.shape_cast %130 : vector<4x256xf32> to vector<1x1x4x256xf32>
    tpu.vector_store %arg3[%c0_61, %c8, %c0_62, %c0_63], %133 {strides = array<i32>} : memref<1x13x4x256xf32, #tpu.memory_space<vmem>>, vector<1x1x4x256xf32>,
    %c112_i32 = arith.constant 112 : i32
    %134 = vector.broadcast %c112_i32 : i32 to vector<1x256xi32>
    %135 = arith.cmpi slt, %0, %134 : vector<1x256xi32>
    %c0_64 = arith.constant 0 : index
    %c0_65 = arith.constant 0 : index
    %c0_66 = arith.constant 0 : index
    %136 = vector.load %arg2[%c0_64, %c0_65, %c0_66] : memref<1x4x256xf32, #tpu.memory_space<vmem>>, vector<1x4x256xf32>
    %137 = vector.shape_cast %136 : vector<1x4x256xf32> to vector<4x256xf32>
    %138 = vector.extract_strided_slice %137 {offsets = [0, 144], sizes = [4, 112], strides = [1, 1]} : vector<4x256xf32> to vector<4x112xf32>
    %139 = vector.extract_strided_slice %137 {offsets = [0, 0], sizes = [4, 144], strides = [1, 1]} : vector<4x256xf32> to vector<4x144xf32>
    %140 = tpu.concatenate %138, %139 in 1 : vector<4x112xf32>, vector<4x144xf32> -> vector<4x256xf32>
    %cst_67 = arith.constant 0.000000e+00 : f32
    %141 = vector.shape_cast %135 : vector<1x256xi1> to vector<1x256xi1>
    %142 = vector.broadcast %141 : vector<1x256xi1> to vector<4x256xi1>
    %143 = vector.broadcast %cst_67 : f32 to vector<4x256xf32>
    %144 = arith.select %142, %140, %143 : vector<4x256xi1>, vector<4x256xf32>
    %c0_68 = arith.constant 0 : index
    %c9 = arith.constant 9 : index
    %c0_69 = arith.constant 0 : index
    %c0_70 = arith.constant 0 : index
    %145 = vector.load %arg3[%c0_68, %c9, %c0_69, %c0_70] : memref<1x13x4x256xf32, #tpu.memory_space<vmem>>, vector<1x1x4x256xf32>
    %146 = vector.shape_cast %145 : vector<1x1x4x256xf32> to vector<4x256xf32>
    %147 = vector.shape_cast %144 : vector<4x256xf32> to vector<1x1x4x256xf32>
    tpu.vector_store %arg3[%c0_68, %c9, %c0_69, %c0_70], %147 {strides = array<i32>} : memref<1x13x4x256xf32, #tpu.memory_space<vmem>>, vector<1x1x4x256xf32>,
    %c144_i32 = arith.constant 144 : i32
    %148 = vector.broadcast %c144_i32 : i32 to vector<1x256xi32>
    %149 = arith.cmpi sge, %0, %148 : vector<1x256xi32>
    %c0_71 = arith.constant 0 : index
    %c0_72 = arith.constant 0 : index
    %c0_73 = arith.constant 0 : index
    %150 = vector.load %arg2[%c0_71, %c0_72, %c0_73] : memref<1x4x256xf32, #tpu.memory_space<vmem>>, vector<1x4x256xf32>
    %151 = vector.shape_cast %150 : vector<1x4x256xf32> to vector<4x256xf32>
    %152 = vector.extract_strided_slice %151 {offsets = [0, 112], sizes = [4, 144], strides = [1, 1]} : vector<4x256xf32> to vector<4x144xf32>
    %153 = vector.extract_strided_slice %151 {offsets = [0, 0], sizes = [4, 112], strides = [1, 1]} : vector<4x256xf32> to vector<4x112xf32>
    %154 = tpu.concatenate %152, %153 in 1 : vector<4x144xf32>, vector<4x112xf32> -> vector<4x256xf32>
    %cst_74 = arith.constant 0.000000e+00 : f32
    %155 = vector.shape_cast %149 : vector<1x256xi1> to vector<1x256xi1>
    %156 = vector.broadcast %155 : vector<1x256xi1> to vector<4x256xi1>
    %157 = vector.broadcast %cst_74 : f32 to vector<4x256xf32>
    %158 = arith.select %156, %154, %157 : vector<4x256xi1>, vector<4x256xf32>
    %c0_75 = arith.constant 0 : index
    %c10 = arith.constant 10 : index
    %c0_76 = arith.constant 0 : index
    %c0_77 = arith.constant 0 : index
    %159 = vector.load %arg3[%c0_75, %c10, %c0_76, %c0_77] : memref<1x13x4x256xf32, #tpu.memory_space<vmem>>, vector<1x1x4x256xf32>
    %160 = vector.shape_cast %159 : vector<1x1x4x256xf32> to vector<4x256xf32>
    %161 = vector.shape_cast %158 : vector<4x256xf32> to vector<1x1x4x256xf32>
    tpu.vector_store %arg3[%c0_75, %c10, %c0_76, %c0_77], %161 {strides = array<i32>} : memref<1x13x4x256xf32, #tpu.memory_space<vmem>>, vector<1x1x4x256xf32>,
    %c7_i32 = arith.constant 7 : i32
    %162 = vector.broadcast %c7_i32 : i32 to vector<1x256xi32>
    %163 = arith.cmpi slt, %16, %162 : vector<1x256xi32>
    %c0_78 = arith.constant 0 : index
    %c0_79 = arith.constant 0 : index
    %c0_80 = arith.constant 0 : index
    %164 = vector.load %arg2[%c0_78, %c0_79, %c0_80] : memref<1x4x256xf32, #tpu.memory_space<vmem>>, vector<1x4x256xf32>
    %165 = vector.shape_cast %164 : vector<1x4x256xf32> to vector<4x256xf32>
    %166 = vector.extract_strided_slice %165 {offsets = [0, 9], sizes = [4, 247], strides = [1, 1]} : vector<4x256xf32> to vector<4x247xf32>
    %167 = vector.extract_strided_slice %165 {offsets = [0, 0], sizes = [4, 9], strides = [1, 1]} : vector<4x256xf32> to vector<4x9xf32>
    %168 = tpu.concatenate %166, %167 in 1 : vector<4x247xf32>, vector<4x9xf32> -> vector<4x256xf32>
    %cst_81 = arith.constant 0.000000e+00 : f32
    %169 = vector.shape_cast %163 : vector<1x256xi1> to vector<1x256xi1>
    %170 = vector.broadcast %169 : vector<1x256xi1> to vector<4x256xi1>
    %171 = vector.broadcast %cst_81 : f32 to vector<4x256xf32>
    %172 = arith.select %170, %168, %171 : vector<4x256xi1>, vector<4x256xf32>
    %c0_82 = arith.constant 0 : index
    %c11 = arith.constant 11 : index
    %c0_83 = arith.constant 0 : index
    %c0_84 = arith.constant 0 : index
    %173 = vector.load %arg3[%c0_82, %c11, %c0_83, %c0_84] : memref<1x13x4x256xf32, #tpu.memory_space<vmem>>, vector<1x1x4x256xf32>
    %174 = vector.shape_cast %173 : vector<1x1x4x256xf32> to vector<4x256xf32>
    %175 = vector.shape_cast %172 : vector<4x256xf32> to vector<1x1x4x256xf32>
    tpu.vector_store %arg3[%c0_82, %c11, %c0_83, %c0_84], %175 {strides = array<i32>} : memref<1x13x4x256xf32, #tpu.memory_space<vmem>>, vector<1x1x4x256xf32>,
    %c9_i32 = arith.constant 9 : i32
    %176 = vector.broadcast %c9_i32 : i32 to vector<1x256xi32>
    %177 = arith.cmpi sge, %16, %176 : vector<1x256xi32>
    %c0_85 = arith.constant 0 : index
    %c0_86 = arith.constant 0 : index
    %c0_87 = arith.constant 0 : index
    %178 = vector.load %arg2[%c0_85, %c0_86, %c0_87] : memref<1x4x256xf32, #tpu.memory_space<vmem>>, vector<1x4x256xf32>
    %179 = vector.shape_cast %178 : vector<1x4x256xf32> to vector<4x256xf32>
    %180 = vector.extract_strided_slice %179 {offsets = [0, 247], sizes = [4, 9], strides = [1, 1]} : vector<4x256xf32> to vector<4x9xf32>
    %181 = vector.extract_strided_slice %179 {offsets = [0, 0], sizes = [4, 247], strides = [1, 1]} : vector<4x256xf32> to vector<4x247xf32>
    %182 = tpu.concatenate %180, %181 in 1 : vector<4x9xf32>, vector<4x247xf32> -> vector<4x256xf32>
    %cst_88 = arith.constant 0.000000e+00 : f32
    %183 = vector.shape_cast %177 : vector<1x256xi1> to vector<1x256xi1>
    %184 = vector.broadcast %183 : vector<1x256xi1> to vector<4x256xi1>
    %185 = vector.broadcast %cst_88 : f32 to vector<4x256xf32>
    %186 = arith.select %184, %182, %185 : vector<4x256xi1>, vector<4x256xf32>
    %c0_89 = arith.constant 0 : index
    %c12 = arith.constant 12 : index
    %c0_90 = arith.constant 0 : index
    %c0_91 = arith.constant 0 : index
    %187 = vector.load %arg3[%c0_89, %c12, %c0_90, %c0_91] : memref<1x13x4x256xf32, #tpu.memory_space<vmem>>, vector<1x1x4x256xf32>
    %188 = vector.shape_cast %187 : vector<1x1x4x256xf32> to vector<4x256xf32>
    %189 = vector.shape_cast %186 : vector<4x256xf32> to vector<1x1x4x256xf32>
    tpu.vector_store %arg3[%c0_89, %c12, %c0_90, %c0_91], %189 {strides = array<i32>} : memref<1x13x4x256xf32, #tpu.memory_space<vmem>>, vector<1x1x4x256xf32>,
    return
  }
  func.func @transform_0(%arg0: i32, %arg1: i32) -> (i32, i32, i32) {
    %c0_i32 = arith.constant 0 : i32
    %c0_i32_0 = arith.constant 0 : i32
    return %arg0, %arg1, %c0_i32 : i32, i32, i32
  }
  func.func @transform_1(%arg0: i32, %arg1: i32) -> (i32, i32, i32, i32) {
    %c0_i32 = arith.constant 0 : i32
    %c0_i32_0 = arith.constant 0 : i32
    %c0_i32_1 = arith.constant 0 : i32
    return %arg0, %c0_i32, %arg1, %c0_i32_0 : i32, i32, i32, i32
  }
}

</mosaic_0001>

<bundles_post_ra>
// kernel: tpu_custom_call.1
= control target key start
LH: loop header
LB: loop body
LE: loop exit
PB: predicated region body
PF: predicated region fallthrough
CT: control target
= control target key end

     0   :  { %6 = vsyncpa [#allocation3], 0  ;;  %s1073_s0 = inlined_call_operand.hbm [shape: f32[2,4,256], index: 0, kind: input, shape index: {}]   ;;  %s1074_s1 = inlined_call_operand.hbm [shape: f32[2,13,4,256], index: 1, kind: output, shape index: {}]  }
   0x1   :  { %8 = vsyncpa [#allocation3 + $0x1], 0 }
   0x2   :  { %9 = vsyncpa [#allocation4], 0 }
   0x3   :  { %11 = vsyncpa [#allocation4 + $0x1], 0  ;;  %s853_s6 = smov 0   ;;  %s855_s7 = smov 0  }
   0x4   :  { %s857_s8 = smov 0   ;;  %s859_s9 = smov 0  }
   0x5   :  { %s861_s10 = smov 0   ;;  %s863_s11 = smov 0  }
   0x6 LB: > { %s607_s12 = sadd.s32 4294967295, %s824_s11   ;;  %s608_s13 = sadd.s32 4294967294, %s824_s11   ;;  %s824_s11 = sphi %s863_s11, %s17_s11   ;;  %s820_s10 = sphi %s861_s10, %s1090_s10   ;;  %s816_s9 = sphi %s859_s9, %s1089_s9   ;;  %s812_s8 = sphi %s857_s8, %s1088_s8   ;;  %s808_s7 = sphi %s855_s7, %s1087_s7   ;;  %s804_s6 = sphi %s853_s6, %s1086_s6  }
   0x7   : > { %s29_s14 = sadd.s32 1, %s820_s10  ;;  %s38_s15 = sadd.s32 1, %s812_s8 }
   0x8   : > { %p31_p0 = scmp.ge.s32.totalorder %s29_s14, 2  ;;  %p45_p1 = scmp.ne.s32.totalorder %s812_s8, %s808_s7 }
   0x9   : > { %p46_p2 = scmp.eq.s32.totalorder %s824_s11, 0  ;;  %p51_p3 = scmp.ne.s32.totalorder %s808_s7, %s804_s6 }
   0xa   : > { %s1092_s14 = smov (%p31_p0, %s29_s14), 0  ;;  %p52_p5 = scmp.eq.s32.totalorder %s607_s12, 0 }
   0xb   : > { %p894_p4 = por %p46_p2, %p45_p1  ;;  %s33_s17 = ssub.s32 %s820_s10, %s1092_s14 }
   0xc   : > { %p77_p6 = scmp.eq.s32.totalorder %s607_s12, 1  ;;  %p36_p7 = scmp.eq.s32.totalorder %s33_s17, 0 }
   0xd   : > { %p900_p8 = por %p52_p5, %p51_p3  ;;  %p83_p10 = scmp.eq.s32.totalorder %s608_s13, 1 }
   0xe   : > { %p904_p9 = por %p77_p6, %p45_p1  ;;  %p646_p13 = scmp.lt.s32.totalorder %s824_s11, 2 }
   0xf   : > { %s909_s20 = scalar_select %p36_p7, %s812_s8, %s38_s15  }
  0x10   : > { %s1078_s19 = scalar_select %p904_p9, 1, 0 }
  0x11   : > { %p911_p11 = por %p83_p10, %p51_p3  ;;  %s103_s22 = sand.u32 1, %s812_s8  }
  0x12   : > { %s611_s23 = sshll.u32 %s103_s22, 3  ;;  %s631_s24 = sshll.u32 %s820_s10, 7 }
  0x13   : > { %s1079_s21 = scalar_select %p911_p11, 1, 0 }
  0x14   : > { %s922_s27 = scalar_lea.hbm %s1073_s0, %s631_s24  ;;  %s107_s28 = scalar_lea.vmem [#allocation2], %s611_s23 }
  0x15   : > { %s117_s29 = sshll.u32 %s107_s28, 4  ;;  %p928_p0 = pnand %p646_p13, %p894_p4  ;;  %s924_s29 = int_to_ptr.vmem [resolvable:$true] %s117_s29 }
  0x16   : > { %s104_s2 = scalar_lea.sflag [#allocation3], %s103_s22  ;;  %s712_s3 = scalar_lea.hbm %s922_s27, 128 }
  0x17   : > { %p713_p3 = scmp.ne.s32.totalorder %s922_s27, %s712_s3  ;;  %p714_p5 = pneg %p928_p0 }
  0x18   : > { %s717_s12 = scalar_lea.hbm %s1073_s0, 256  ;;  %p718_p4 = scmp.lt.u32.totalorder %s922_s27, %s1073_s0 }
  0x19   : > { %p715_p6 = pnand %p714_p5, %p713_p3  ;;  %p719_p10 = scmp.lt.u32.totalorder %s717_s12, %s712_s3 }
  0x1a   : > { %p721_p12 = scmp.lt.u32.totalorder %s712_s3, %s922_s27 }
  0x1b   : > { %p716_p7 = pneg %p715_p6  ;;  %p720_p13 = por %p719_p10, %p718_p4 }
  0x1d   : > { %p722_p1 = por %p721_p12, %p720_p13 }
  0x1f   : > { %p723_p2 = pnand %p722_p1, %p716_p7 }
  0x21   : > { %726 = shalt.err (!%p723_p2)
}
  0x22   : > { %s727_s16 = scalar_lea.vmem %s924_s29, 128  ;;  %s826_s17 = smov [#allocation2]  }
  0x23   : > { %p728_p3 = scmp.ne.s32.totalorder %s924_s29, %s727_s16  ;;  %s732_s22 = sshll.u32 %s826_s17, 4  ;;  %s733_s22 = int_to_ptr.vmem [resolvable:$false] %s732_s22 }
  0x24   : > { %s734_s23 = scalar_lea.vmem %s733_s22, 256  ;;  %p735_p9 = scmp.lt.s32.totalorder %s924_s29, %s733_s22 }
  0x25   : > { %p730_p6 = pnand %p728_p3, %p714_p5  ;;  %p736_p4 = scmp.lt.s32.totalorder %s734_s23, %s727_s16 }
  0x27   : > { %p731_p11 = pneg %p730_p6  ;;  %p737_p10 = por %p736_p4, %p735_p9 }
  0x29   : > { %p738_p12 = pnand %p737_p10, %p731_p11 }
  0x2b   : > { %741 = shalt.err (!%p738_p12)
}
  0x2c   : > { %641 = dma.hbm_to_vmem [thread:$0]  (!%p928_p0), %s922_s27, 128, %s924_s29, %s104_s2  }
  0x2d   : > { %p1081_p1 = scmp.lt.s32.totalorder %s824_s11, 3  ;;  %p1082_p2 = scmp.ge.s32.totalorder %s824_s11, 1 }
  0x2f   : > { %p123_p5 = pnand %p1082_p2, %p1081_p1 }
  0x30   : > { %s964_s24 = sand.u32 (!%p123_p5), 1, %s808_s7  }
  0x31   : > { %126 = sbr.rel (%p123_p5) target bundleno = 237 (0xed), region = 24  ;;  %s615_s25 = sshll.u32 (!%p123_p5), %s964_s24, 3 }
  0x32   : > { %s129_s26 = scalar_lea.sflag (!%p123_p5), [#allocation3], %s964_s24  ;;  %s132_s28 = scalar_lea.vmem (!%p123_p5), [#allocation2], %s615_s25 }
  0x38   : > { %795 = dma.done.wait (%p900_p8), %s129_s26, 128  }
  0x39   : > { %797 = vsyncadd (%p900_p8), %s129_s26, 4294967168  ;;  %s632_s27 = smul.u32 104, %s964_s24  ;;  %v209_v0 = vld [vmem:[%s132_s28] sm:$0xff]  ;;  %s827_s29 = smov 48   ;;  %v151_v2 = vlaneseq  ;;  %vm217_vm0 = vcmask 392192   ;;  %vm243_vm2 = vcmask 1022976  }
  0x3a   : > { %215 = vrot.lane.b32.xlu1 %v209_v0, %s827_s29  ;;  %v211_v1 = vcombine.high %v209_v0, %v209_v0  ;;  %s828_s30 = smov 80   ;;  %s829_s3 = smov 125   ;;  %vm189_vm3 = vcmask 654336   ;;  %vm271_vm7 = vcmask 23552   ;;  %vm297_vm10 = vcmask 261120  }
  0x3b   : > { %185 = vrot.lane.b32.xlu0 %v209_v0, %s828_s30  ;;  %s973_s2 = scalar_lea.vmem [#allocation5], %s632_s27  ;;  %s830_s4 = smov 3   ;;  %v976_v3 = vand.u32 127, %v151_v2  ;;  %vm325_vm12 = vcmask 785408   ;;  %vm351_vm14 = vcmask 998400   ;;  %v839_v63 = vmov 0.0  }
  0x3c   : > { %179 = vst [vmem:[%s973_s2] sm:$0xff] %v209_v0  ;;  %s831_s18 = smov 32   ;;  %s832_s5 = smov 96  }
  0x3d   : > { %s833_s12 = smov 122   ;;  %s834_s13 = smov 6   ;;  %v979_v4 = vadd.s32 128, %v976_v3  ;;  %vm207_vm1 = vcmp.ge.s32.totalorder %v976_v3, 48  ;;  %v983_v7 = vand.u32 15, %v976_v3  ;;  %vm315_vm13 = vcmp.ge.s32.totalorder %v976_v3, 96 }
  0x3e   : > { %212 = vrot.lane.b32.xlu1 %v211_v1, %s827_s29  ;;  %s835_s15 = smov 112   ;;  %s836_s16 = smov 16  }
  0x3f   : > { %239 = vrot.lane.b32.xlu0 %v209_v0, %s829_s3  ;;  %s837_s17 = smov 119   ;;  %s838_s22 = smov 9   ;;  %v986_v8 = vand.u32 15, %v979_v4  ;;  %vm234_vm4 = vcmp.lt.s32.totalorder %v983_v7, 13  ;;  %vm181_vm6 = vcmp.lt.s32.totalorder %v979_v4, 208  ;;  %vm261_vm8 = vcmp.ge.s32.totalorder %v983_v7, 3 }
  0x40   : > { %vm289_vm11 = vcmp.lt.s32.totalorder %v979_v4, 160  ;;  %vm342_vm15 = vcmp.lt.s32.totalorder %v983_v7, 10  ;;  %s633_s23 = smul.u32 1664, %s816_s9  ;;  %s520_s25 = sshll.u32 %s973_s2, 4  ;;  %s1023_s25 = int_to_ptr.vmem [resolvable:$true] %s520_s25 }
  0x41   : > { %vm235_vm5 = vcmp.lt.s32.totalorder %v986_v8, 13  ;;  %vm262_vm9 = vcmp.ge.s32.totalorder %v986_v8, 3  ;;  %s505_s9 = scalar_lea.sflag [#allocation4], %s964_s24  ;;  %s742_s29 = scalar_lea.vmem %s1023_s25, 1664 }
  0x42   : > { %241 = vrot.lane.b32.xlu1 %v211_v1, %s829_s3  ;;  %s1021_s27 = scalar_lea.hbm %s1074_s1, %s633_s23  ;;  %p743_p8 = scmp.ne.s32.totalorder %s1023_s25, %s742_s29 }
  0x43   : > { %187 = vrot.lane.b32.xlu0 %v211_v1, %s828_s30  ;;  %p1083_p9 = scmp.ne.s32.totalorder %s1078_s19, 0  ;;  %s840_s30 = smov [#allocation5]  }
  0x44   : > { %s746_s3 = sshll.u32 %s840_s30, 4  ;;  %s747_s3 = int_to_ptr.vmem [resolvable:$false] %s746_s3 }
  0x45   : > { %p744_p11 = pnand %p743_p8, %p1083_p9  ;;  %p749_p7 = scmp.lt.s32.totalorder %s1023_s25, %s747_s3 }
  0x46   : > { %269 = vrot.lane.b32.xlu1 %v209_v0, %s830_s4 }
  0x47   : > { %266 = vrot.lane.b32.xlu0 %v211_v1, %s830_s4  ;;  %p745_p0 = pneg %p744_p11  ;;  %s748_s4 = scalar_lea.vmem %s747_s3, 3328 }
  0x48   : > { %p750_p13 = scmp.lt.s32.totalorder %s748_s4, %s742_s29 }
  0x4a   : > { %295 = vrot.lane.b32.xlu1 %v211_v1, %s831_s18  ;;  %p751_p3 = por %p750_p13, %p749_p7 }
  0x4b   : > { %293 = vrot.lane.b32.xlu0 %v209_v0, %s831_s18 }
  0x4c   : > { %p752_p6 = pnand %p751_p3, %p745_p0 }
  0x4e   : > { %323 = vrot.lane.b32.xlu1 %v209_v0, %s832_s5 }
  0x4f   : > { %320 = vrot.lane.b32.xlu0 %v211_v1, %s832_s5 }
  0x52   : > { %349 = vrot.lane.b32.xlu1 %v211_v1, %s833_s12 }
  0x53   : > { %347 = vrot.lane.b32.xlu0 %v209_v0, %s833_s12 }
  0x56   : > { %377 = vrot.lane.b32.xlu1 %v209_v0, %s834_s13 }
  0x57   : > { %374 = vrot.lane.b32.xlu0 %v211_v1, %s834_s13 }
  0x5a   : > { %404 = vrot.lane.b32.xlu1 %v209_v0, %s835_s15 }
  0x5b   : > { %401 = vrot.lane.b32.xlu0 %v211_v1, %s835_s15 }
  0x5e   : > { %430 = vrot.lane.b32.xlu1 %v211_v1, %s836_s16 }
  0x5f   : > { %428 = vrot.lane.b32.xlu0 %v209_v0, %s836_s16 }
  0x62   : > { %457 = vrot.lane.b32.xlu1 %v211_v1, %s837_s17 }
  0x63   : > { %455 = vrot.lane.b32.xlu0 %v209_v0, %s837_s17 }
  0x66   : > { %485 = vrot.lane.b32.xlu1 %v209_v0, %s838_s22 }
  0x67   : > { %482 = vrot.lane.b32.xlu0 %v211_v1, %s838_s22 }
  0xac   : > { %v216_v5 = vpop.permute.xlu1 %215 }
  0xad   : > { %v186_v6 = vpop.permute.xlu0 %185 }
  0xb0   : > { %v213_v9 = vpop.permute.xlu1 %212 }
  0xb1   : > { %v240_v10 = vpop.permute.xlu0 %239  ;;  %v218_v11 = vsel %vm217_vm0, %v216_v5, %v213_v9  ;;  %v221_v12 = vsel %vm217_vm0, %v213_v9, %v216_v5  ;;  %vm343_vm0 = vcmp.lt.s32.totalorder %v986_v8, 10 }
  0xb2   : > { %v226_v13 = vsel %vm207_vm1, %v221_v12, 0.0  ;;  %vm379_vm1 = vcmask 48128  }
  0xb3   : > { %v230_v14 = vcombine.low %v226_v13, %v218_v11 }
  0xb4   : > { %v242_v15 = vpop.permute.xlu1 %241 }
  0xb5   : > { %v188_v16 = vpop.permute.xlu0 %187  ;;  %617 = vst [vmem:[%s973_s2 + $0x10] sm:$0xff] %v230_v14  ;;  %v244_v17 = vsel %vm243_vm2, %v240_v10, %v242_v15  ;;  %v248_v18 = vsel %vm243_vm2, %v242_v15, %v240_v10  ;;  %vm369_vm2 = vcmp.ge.s32.totalorder %v983_v7, 6 }
  0xb6   : > { %v190_v19 = vsel %vm189_vm3, %v186_v6, %v188_v16  ;;  %v194_v20 = vsel %vm189_vm3, %v188_v16, %v186_v6  ;;  %v253_v21 = vsel %vm234_vm4, %v244_v17, 0.0  ;;  %v254_v22 = vsel %vm235_vm5, %v248_v18, 0.0 }
  0xb7   : > { %v200_v23 = vsel %vm181_vm6, %v194_v20, 0.0  ;;  %v257_v24 = vcombine.low %v253_v21, %v254_v22  ;;  %vm370_vm3 = vcmp.ge.s32.totalorder %v986_v8, 6  ;;  %vm406_vm4 = vcmask 916480  }
  0xb8   : > { %v203_v25 = vcombine.low %v190_v19, %v200_v23  ;;  %v270_v26 = vpop.permute.xlu1 %269  ;;  %vm396_vm5 = vcmp.lt.s32.totalorder %v976_v3, 112  ;;  %vm432_vm6 = vcmask 130048  }
  0xb9   : > { %v267_v27 = vpop.permute.xlu0 %266  ;;  %618 = vst [vmem:[%s973_s2 + $0x18] sm:$0xff] %v257_v24 }
  0xba   : > { %616 = vst [vmem:[%s973_s2 + $0x8] sm:$0xff] %v203_v25  ;;  %v272_v28 = vsel %vm271_vm7, %v270_v26, %v267_v27  ;;  %v275_v29 = vsel %vm271_vm7, %v267_v27, %v270_v26  ;;  %vm424_vm7 = vcmp.ge.s32.totalorder %v979_v4, 144 }
  0xbb   : > { %v280_v30 = vsel %vm261_vm8, %v275_v29, 0.0  ;;  %v281_v31 = vsel %vm262_vm9, %v272_v28, 0.0  ;;  %vm459_vm8 = vcmask 973824   ;;  %vm450_vm9 = vcmp.lt.s32.totalorder %v983_v7, 7 }
  0xbc   : > { %v284_v32 = vcombine.low %v280_v30, %v281_v31  ;;  %v296_v33 = vpop.permute.xlu1 %295 }
  0xbd   : > { %v294_v34 = vpop.permute.xlu0 %293 }
  0xbe   : > { %619 = vst [vmem:[%s973_s2 + $0x20] sm:$0xff] %v284_v32  ;;  %v298_v35 = vsel %vm297_vm10, %v294_v34, %v296_v33  ;;  %v302_v36 = vsel %vm297_vm10, %v296_v33, %v294_v34  ;;  %vm451_vm10 = vcmp.lt.s32.totalorder %v986_v8, 7 }
  0xbf   : > { %v308_v37 = vsel %vm289_vm11, %v302_v36, 0.0  ;;  %vm487_vm11 = vcmask 72704  }
  0xc0   : > { %v311_v38 = vcombine.low %v298_v35, %v308_v37  ;;  %v324_v39 = vpop.permute.xlu1 %323 }
  0xc1   : > { %v321_v40 = vpop.permute.xlu0 %320 }
  0xc2   : > { %620 = vst [vmem:[%s973_s2 + $0x28] sm:$0xff] %v311_v38  ;;  %v326_v41 = vsel %vm325_vm12, %v324_v39, %v321_v40  ;;  %v329_v42 = vsel %vm325_vm12, %v321_v40, %v324_v39  ;;  %vm477_vm12 = vcmp.ge.s32.totalorder %v983_v7, 9 }
  0xc3   : > { %v334_v43 = vsel %vm315_vm13, %v329_v42, 0.0  ;;  %vm478_vm13 = vcmp.ge.s32.totalorder %v986_v8, 9 }
  0xc4   : > { %v338_v44 = vcombine.low %v334_v43, %v326_v41  ;;  %v350_v45 = vpop.permute.xlu1 %349 }
  0xc5   : > { %v348_v46 = vpop.permute.xlu0 %347 }
  0xc6   : > { %621 = vst [vmem:[%s973_s2 + $0x30] sm:$0xff] %v338_v44  ;;  %v352_v47 = vsel %vm351_vm14, %v348_v46, %v350_v45  ;;  %v356_v48 = vsel %vm351_vm14, %v350_v45, %v348_v46 }
  0xc7   : > { %v361_v49 = vsel %vm342_vm15, %v352_v47, 0.0  ;;  %v362_v50 = vsel %vm343_vm0, %v356_v48, 0.0 }
  0xc8   : > { %v365_v51 = vcombine.low %v361_v49, %v362_v50  ;;  %v378_v52 = vpop.permute.xlu1 %377 }
  0xc9   : > { %v375_v53 = vpop.permute.xlu0 %374 }
  0xca   : > { %622 = vst [vmem:[%s973_s2 + $0x38] sm:$0xff] %v365_v51  ;;  %v380_v54 = vsel %vm379_vm1, %v378_v52, %v375_v53  ;;  %v383_v55 = vsel %vm379_vm1, %v375_v53, %v378_v52 }
  0xcb   : > { %v388_v56 = vsel %vm369_vm2, %v383_v55, 0.0  ;;  %v389_v57 = vsel %vm370_vm3, %v380_v54, 0.0 }
  0xcc   : > { %v392_v58 = vcombine.low %v388_v56, %v389_v57  ;;  %v405_v59 = vpop.permute.xlu1 %404 }
  0xcd   : > { %v402_v60 = vpop.permute.xlu0 %401 }
  0xce   : > { %623 = vst [vmem:[%s973_s2 + $0x40] sm:$0xff] %v392_v58  ;;  %v410_v61 = vsel %vm406_vm4, %v402_v60, %v405_v59 }
  0xcf   : > { %v415_v62 = vsel %vm396_vm5, %v410_v61, 0.0 }
  0xd0   : > { %v419_v0 = vcombine.low %v415_v62, %v839_v63  ;;  %v431_v1 = vpop.permute.xlu1 %430 }
  0xd1   : > { %v429_v2 = vpop.permute.xlu0 %428 }
  0xd2   : > { %624 = vst [vmem:[%s973_s2 + $0x48] sm:$0xff] %v419_v0  ;;  %v437_v5 = vsel %vm432_vm6, %v431_v1, %v429_v2 }
  0xd3   : > { %v443_v6 = vsel %vm424_vm7, %v437_v5, 0.0 }
  0xd4   : > { %v446_v3 = vcombine.low %v839_v63, %v443_v6  ;;  %v458_v9 = vpop.permute.xlu1 %457 }
  0xd5   : > { %v456_v10 = vpop.permute.xlu0 %455 }
  0xd6   : > { %625 = vst [vmem:[%s973_s2 + $0x50] sm:$0xff] %v446_v3  ;;  %v460_v11 = vsel %vm459_vm8, %v456_v10, %v458_v9  ;;  %v464_v12 = vsel %vm459_vm8, %v458_v9, %v456_v10 }
  0xd7   : > { %v469_v4 = vsel %vm450_vm9, %v460_v11, 0.0  ;;  %v470_v13 = vsel %vm451_vm10, %v464_v12, 0.0 }
  0xd8   : > { %v473_v14 = vcombine.low %v469_v4, %v470_v13  ;;  %v486_v15 = vpop.permute.xlu1 %485 }
  0xd9   : > { %v483_v16 = vpop.permute.xlu0 %482 }
  0xda   : > { %626 = vst [vmem:[%s973_s2 + $0x58] sm:$0xff] %v473_v14  ;;  %v488_v17 = vsel %vm487_vm11, %v486_v15, %v483_v16  ;;  %v491_v18 = vsel %vm487_vm11, %v483_v16, %v486_v15 }
  0xdb   : > { %v496_v19 = vsel %vm477_vm12, %v491_v18, 0.0  ;;  %v497_v20 = vsel %vm478_vm13, %v488_v17, 0.0 }
  0xdc   : > { %v500_v7 = vcombine.low %v496_v19, %v497_v20 }
  0xde   : > { %627 = vst [vmem:[%s973_s2 + $0x60] sm:$0xff] %v500_v7 }
  0xdf   : > { %755 = shalt.err (!%p752_p6)
}
  0xe0   : > { %s756_s2 = scalar_lea.hbm %s1021_s27, 1664  ;;  %s760_s12 = scalar_lea.hbm %s1074_s1, 3328 }
  0xe1   : > { %p757_p4 = scmp.ne.s32.totalorder %s1021_s27, %s756_s2  ;;  %p761_p1 = scmp.lt.u32.totalorder %s1021_s27, %s1074_s1 }
  0xe2   : > { %p762_p2 = scmp.lt.u32.totalorder %s760_s12, %s756_s2  ;;  %p764_p8 = scmp.lt.u32.totalorder %s756_s2, %s1021_s27 }
  0xe3   : > { %p758_p10 = pnand %p757_p4, %p1083_p9 }
  0xe4   : > { %p763_p5 = por %p762_p2, %p761_p1 }
  0xe5   : > { %p759_p12 = pneg %p758_p10 }
  0xe6   : > { %p765_p11 = por %p764_p8, %p763_p5 }
  0xe8   : > { %p766_p0 = pnand %p765_p11, %p759_p12 }
  0xea   : > { %769 = shalt.err (!%p766_p0)
}
  0xeb   : > { %s841_s16 = smov 128   ;;  %s842_s17 = smov 8  }
  0xec   : > { %636 = dma.vmem_to_hbm [thread:$0]  (%p1083_p9), %s1023_s25, 1664, %s1021_s27, %s505_s9, %s841_s16, %s841_s16, %s842_s17  }
  0xed PF: > { %s535_s22 = sand.u32 1, %s804_s6   ;;  %p1084_p7 = scmp.ne.s32.totalorder %s1079_s21, 0 }
  0xee   : > { %p1085_p13 = scmp.ge.s32.totalorder %s824_s11, 2  ;;  %s536_s23 = scalar_lea.sflag [#allocation4], %s535_s22 }
  0xf0   : > { %p643_p3 = pnand %p1085_p13, %p1084_p7 }
  0xf2   : > { %799 = dma.done.wait (!%p643_p3), %s536_s23, 1664  }
  0xf3   : > { %801 = vsyncadd (!%p643_p3), %s536_s23, 4294965632  ;;  %s17_s11 = sadd.s32 1, %s824_s11   ;;  %s1086_s6 = smov %s808_s7 }
  0xf4   : > { %p14_p6 = scmp.ge.s32.totalorder %s17_s11, 4   ;;  %s1087_s7 = smov %s812_s8 }
  0xf5   : > { %s1088_s8 = smov %s909_s20  ;;  %s1089_s9 = smov %s820_s10 }
  0xf6   : > { %s1090_s10 = smov %s1092_s14  ;;  %16 = sbr.rel (!%p14_p6) target bundleno = 6 (0x6), region = 81 }
  0xfd   :  { %541 = vsyncpa [#allocation3], 1 }
  0xfe   :  { %543 = vsyncpa [#allocation3 + $0x1], 1 }
  0xff   :  { %544 = vsyncpa [#allocation4], 1 }
 0x100   :  { %546 = vsyncpa [#allocation4 + $0x1], 1 }

</bundles_post_ra>
